<compile_context>
chip_gen: v7x
topology: tpu7x:2x2x1
jax: 0.10.0
libtpu: 0.0.40
codegen_flags: <defaults>
</compile_context>

<pallas_src>
import functools

import jax
import jax.numpy as jnp
from jax import lax
from jax.experimental import pallas as pl
from jax.experimental.pallas import tpu as pltpu

_NEG_BIG = -1.0e30  # "minus infinity" that stays NaN-free in online softmax


def _make_attention_kernel(H, D, scale, masked):
    """Returns a flash-attention kernel body for H heads of width D."""

    def kernel(q_ref, k_ref, v_ref, *rest):
        if masked:
            qb_ref, kb_ref, o_ref, m_sc, l_sc, acc_sc = rest
        else:
            o_ref, m_sc, l_sc, acc_sc = rest

        si = pl.program_id(2)

        @pl.when(si == 0)
        def _init():
            m_sc[...] = jnp.full_like(m_sc, _NEG_BIG)
            l_sc[...] = jnp.zeros_like(l_sc)
            acc_sc[...] = jnp.zeros_like(acc_sc)

        # 1/sqrt(D) folded into q: tL*H*D multiplies instead of H*tL*tS.
        q = q_ref[0] * scale          # (tL, H*D)
        k = k_ref[0]                  # (tS, H*D)
        v = v_ref[0]                  # (tS, H*D)

        if masked:
            # Additive bias, built once and shared by all heads.
            bias = qb_ref[0] + kb_ref[0]          # (tL,1)+(1,tS) -> (tL,tS)

        for h in range(H):            # H is small and static -> unrolled
            sl = slice(h * D, (h + 1) * D)
            # QK^T for this head, contraction over D on the MXU.
            s = lax.dot_general(
                q[:, sl], k[:, sl], (((1,), (1,)), ((), ())),
                preferred_element_type=jnp.float32)          # (tL, tS)
            if masked:
                s = s + bias

            m_prev = m_sc[h]                                  # (tL, 1)
            m_new = jnp.maximum(m_prev, jnp.max(s, axis=-1, keepdims=True))
            alpha = jnp.exp(m_prev - m_new)                   # (tL, 1)
            p = jnp.exp(s - m_new)                            # (tL, tS)

            l_sc[h] = alpha * l_sc[h] + jnp.sum(p, axis=-1, keepdims=True)
            m_sc[h] = m_new
            # Un-normalized accumulation (normalization deferred to finalize).
            acc_sc[:, sl] = alpha * acc_sc[:, sl] + jnp.dot(
                p.astype(v.dtype), v[:, sl],
                preferred_element_type=jnp.float32)

        @pl.when(si == pl.num_programs(2) - 1)
        def _finalize():
            for h in range(H):
                sl = slice(h * D, (h + 1) * D)
                acc_sc[:, sl] = acc_sc[:, sl] * pl.reciprocal(
                    l_sc[h], approx=True)
            # Single lane-dense (tL, H*D) store of the output block.
            o_ref[0] = acc_sc[...].astype(o_ref.dtype)

    return kernel


def _pick_tile(dim, target, multiple):
    """Largest tile <= target that divides dim and is a multiple of `multiple`
    (falls back to the full dim, which is always layout-legal)."""
    if dim <= target:
        return dim
    t = (target // multiple) * multiple
    while t >= multiple:
        if dim % t == 0:
            return t
        t -= multiple
    return dim


def full_attention(queries, keys, values, q_mask=None, kv_mask=None,
                   block_l=128, block_s=512):
    """Pallas equivalent of FullAttention.forward.

    queries: [N, L, H, D], keys/values: [N, S, H, D]
    q_mask: [N, L] (bool), kv_mask: [N, S] (bool)
    returns: [N, L, H, D]
    """
    N, L, H, D = queries.shape
    S = keys.shape[1]
    HD = H * D

    # Trailing-dim merge: free reshape, no transpose / extra HBM traffic.
    q3 = queries.reshape(N, L, HD)
    k3 = keys.reshape(N, S, HD)
    v3 = values.reshape(N, S, HD)

    tL = _pick_tile(L, block_l, 8)
    tS = _pick_tile(S, block_s, 128)
    grid = (N, L // tL, S // tS)

    scale = 1.0 / float(D) ** 0.5
    masked = kv_mask is not None   # mirrors the PyTorch `if kv_mask is not None`

    in_specs = [
        pl.BlockSpec((1, tL, HD), lambda n, li, si: (n, li, 0)),
        pl.BlockSpec((1, tS, HD), lambda n, li, si: (n, si, 0)),
        pl.BlockSpec((1, tS, HD), lambda n, li, si: (n, si, 0)),
    ]
    args = [q3, k3, v3]

    if masked:
        if q_mask is None:
            q_mask = jnp.ones((N, L), dtype=bool)
        qb = jnp.where(q_mask, 0.0, _NEG_BIG).astype(jnp.float32).reshape(N, L, 1)
        kb = jnp.where(kv_mask, 0.0, _NEG_BIG).astype(jnp.float32).reshape(N, 1, S)
        in_specs += [
            pl.BlockSpec((1, tL, 1), lambda n, li, si: (n, li, 0)),
            pl.BlockSpec((1, 1, tS), lambda n, li, si: (n, 0, si)),
        ]
        args += [qb, kb]

    kernel = _make_attention_kernel(H, D, scale, masked)

    out3 = pl.pallas_call(
        kernel,
        out_shape=jax.ShapeDtypeStruct((N, L, HD), queries.dtype),
        grid_spec=pltpu.PrefetchScalarGridSpec(
            num_scalar_prefetch=0,
            grid=grid,
            in_specs=in_specs,
            out_specs=pl.BlockSpec((1, tL, HD), lambda n, li, si: (n, li, 0)),
            scratch_shapes=[
                pltpu.VMEM((H, tL, 1), jnp.float32),   # running max
                pltpu.VMEM((H, tL, 1), jnp.float32),   # running denom
                pltpu.VMEM((tL, HD), jnp.float32),     # output accumulator
            ],
        ),
        compiler_params=pltpu.CompilerParams(
            dimension_semantics=("parallel", "parallel", "arbitrary"),
            vmem_limit_bytes=32 * 1024 * 1024,
        ),
    )(*args)

    # Free trailing-dim split back to [N, L, H, D].
    return out3.reshape(N, L, H, D)


def _reference_full_attention(queries, keys, values, q_mask=None, kv_mask=None):
    """Pure-JAX reference mirroring the PyTorch forward, for verification."""
    QK = jnp.einsum('nlhd,nshd->nlsh', queries, keys)
    if kv_mask is not None:
        valid = (q_mask[:, :, None, None] & kv_mask[:, None, :, None])
        QK = jnp.where(valid, QK, -jnp.inf)
    temp = 1.0 / (queries.shape[3] ** 0.5)
    A = jax.nn.softmax(temp * QK, axis=2)
    return jnp.einsum('nlsh,nshd->nlhd', A, values)


if __name__ == "__main__":
    key = jax.random.PRNGKey(0)

    # --- Test 1: small shapes (single tile per batch) --------------------
    N, L, S, H, D = 2, 8, 8, 4, 32
    kq, kk, kv = jax.random.split(key, 3)
    queries = jax.random.normal(kq, (N, L, H, D), dtype=jnp.float32)
    keys = jax.random.normal(kk, (N, S, H, D), dtype=jnp.float32)
    values = jax.random.normal(kv, (N, S, H, D), dtype=jnp.float32)

    q_mask = jnp.ones((N, L), dtype=bool)
    kv_mask = jnp.concatenate(
        [jnp.ones((N, S - 2), dtype=bool), jnp.zeros((N, 2), dtype=bool)], axis=1)

    out = full_attention(queries, keys, values, q_mask, kv_mask)
    jax.block_until_ready(out)
    ref = _reference_full_attention(queries, keys, values, q_mask, kv_mask)
    assert jnp.allclose(out, ref, atol=5e-3, rtol=5e-3), "masked attention mismatch"

    out2 = full_attention(queries, keys, values)
    jax.block_until_ready(out2)
    ref2 = _reference_full_attention(queries, keys, values)
    assert jnp.allclose(out2, ref2, atol=5e-3, rtol=5e-3), "unmasked attention mismatch"

    # --- Test 2: exercises the flash tiling (multiple L and S tiles) -----
    N2, L2, S2 = 2, 128, 256
    kq2, kk2, kv2 = jax.random.split(jax.random.PRNGKey(1), 3)
    q2 = jax.random.normal(kq2, (N2, L2, H, D), dtype=jnp.float32)
    k2 = jax.random.normal(kk2, (N2, S2, H, D), dtype=jnp.float32)
    v2 = jax.random.normal(kv2, (N2, S2, H, D), dtype=jnp.float32)
    qm2 = jnp.ones((N2, L2), dtype=bool)
    kvm2 = jnp.concatenate(
        [jnp.ones((N2, S2 - 64), dtype=bool), jnp.zeros((N2, 64), dtype=bool)],
        axis=1)

    out3 = full_attention(q2, k2, v2, qm2, kvm2, block_l=64, block_s=128)
    jax.block_until_ready(out3)
    ref3 = _reference_full_attention(q2, k2, v2, qm2, kvm2)
    assert jnp.allclose(out3, ref3, atol=5e-3, rtol=5e-3), "tiled attention mismatch"

    print("KERNEL_OK")
</pallas_src>

<mosaic_0001>
module attributes {stable_mosaic.version = 11 : i64} {
  func.func @kernel(%arg0: i32, %arg1: i32, %arg2: i32, %arg3: memref<1x8x128xf32, #tpu.memory_space<vmem>>, %arg4: memref<1x8x128xf32, #tpu.memory_space<vmem>>, %arg5: memref<1x8x128xf32, #tpu.memory_space<vmem>>, %arg6: memref<1x8x1xf32, #tpu.memory_space<vmem>>, %arg7: memref<1x1x8xf32, #tpu.memory_space<vmem>>, %arg8: memref<1x8x128xf32, #tpu.memory_space<vmem>>, %arg9: memref<4x8x1xf32, #tpu.memory_space<vmem>>, %arg10: memref<4x8x1xf32, #tpu.memory_space<vmem>>, %arg11: memref<8x128xf32, #tpu.memory_space<vmem>>) attributes {dimension_semantics = [#tpu.dimension_semantics<parallel>, #tpu.dimension_semantics<parallel>, #tpu.dimension_semantics<arbitrary>], iteration_bounds = array<i64: 2, 1, 1>, scalar_prefetch = 0 : i64, scratch_operands = 3 : i64, tpu.core_type = #tpu.core_type<tc>, window_params = [{transform_indices = @transform_0, window_bounds = array<i64: 1, 8, 128>}, {transform_indices = @transform_1, window_bounds = array<i64: 1, 8, 128>}, {transform_indices = @transform_2, window_bounds = array<i64: 1, 8, 128>}, {transform_indices = @transform_3, window_bounds = array<i64: 1, 8, 1>}, {transform_indices = @transform_4, window_bounds = array<i64: 1, 1, 8>}, {transform_indices = @transform_5, window_bounds = array<i64: 1, 8, 128>}]} {
    %c0_i32 = arith.constant 0 : i32
    %0 = arith.cmpi eq, %arg2, %c0_i32 : i32
    %1 = arith.extui %0 : i1 to i32
    %c0_i32_0 = arith.constant 0 : i32
    %2 = arith.cmpi ne, %1, %c0_i32_0 : i32
    scf.if %2 {
      %cst_91 = arith.constant -1.000000e+30 : f32
      %153 = vector.broadcast %cst_91 : f32 to vector<4x8x1xf32>
      %c0_92 = arith.constant 0 : index
      %c0_93 = arith.constant 0 : index
      %c0_94 = arith.constant 0 : index
      %154 = vector.load %arg9[%c0_92, %c0_93, %c0_94] : memref<4x8x1xf32, #tpu.memory_space<vmem>>, vector<4x8x1xf32>
      tpu.vector_store %arg9[%c0_92, %c0_93, %c0_94], %153 {strides = array<i32>} : memref<4x8x1xf32, #tpu.memory_space<vmem>>, vector<4x8x1xf32>,
      %cst_95 = arith.constant 0.000000e+00 : f32
      %155 = vector.broadcast %cst_95 : f32 to vector<4x8x1xf32>
      %c0_96 = arith.constant 0 : index
      %c0_97 = arith.constant 0 : index
      %c0_98 = arith.constant 0 : index
      %156 = vector.load %arg10[%c0_96, %c0_97, %c0_98] : memref<4x8x1xf32, #tpu.memory_space<vmem>>, vector<4x8x1xf32>
      tpu.vector_store %arg10[%c0_96, %c0_97, %c0_98], %155 {strides = array<i32>} : memref<4x8x1xf32, #tpu.memory_space<vmem>>, vector<4x8x1xf32>,
      %cst_99 = arith.constant 0.000000e+00 : f32
      %157 = vector.broadcast %cst_99 : f32 to vector<8x128xf32>
      %c0_100 = arith.constant 0 : index
      %c0_101 = arith.constant 0 : index
      %158 = vector.load %arg11[%c0_100, %c0_101] : memref<8x128xf32, #tpu.memory_space<vmem>>, vector<8x128xf32>
      tpu.vector_store %arg11[%c0_100, %c0_101], %157 {strides = array<i32>} : memref<8x128xf32, #tpu.memory_space<vmem>>, vector<8x128xf32>,
    } else {
    }
    %c0 = arith.constant 0 : index
    %c0_1 = arith.constant 0 : index
    %c0_2 = arith.constant 0 : index
    %3 = vector.load %arg3[%c0, %c0_1, %c0_2] : memref<1x8x128xf32, #tpu.memory_space<vmem>>, vector<1x8x128xf32>
    %4 = vector.shape_cast %3 : vector<1x8x128xf32> to vector<8x128xf32>
    %cst = arith.constant 0.176776692 : f32
    %5 = vector.broadcast %cst : f32 to vector<8x128xf32>
    %6 = arith.mulf %4, %5 : vector<8x128xf32>
    %c0_3 = arith.constant 0 : index
    %c0_4 = arith.constant 0 : index
    %c0_5 = arith.constant 0 : index
    %7 = vector.load %arg4[%c0_3, %c0_4, %c0_5] : memref<1x8x128xf32, #tpu.memory_space<vmem>>, vector<1x8x128xf32>
    %8 = vector.shape_cast %7 : vector<1x8x128xf32> to vector<8x128xf32>
    %c0_6 = arith.constant 0 : index
    %c0_7 = arith.constant 0 : index
    %c0_8 = arith.constant 0 : index
    %9 = vector.load %arg5[%c0_6, %c0_7, %c0_8] : memref<1x8x128xf32, #tpu.memory_space<vmem>>, vector<1x8x128xf32>
    %10 = vector.shape_cast %9 : vector<1x8x128xf32> to vector<8x128xf32>
    %c0_9 = arith.constant 0 : index
    %c0_10 = arith.constant 0 : index
    %c0_11 = arith.constant 0 : index
    %11 = vector.load %arg6[%c0_9, %c0_10, %c0_11] : memref<1x8x1xf32, #tpu.memory_space<vmem>>, vector<1x8x1xf32>
    %12 = vector.shape_cast %11 : vector<1x8x1xf32> to vector<8x1xf32>
    %c0_12 = arith.constant 0 : index
    %c0_13 = arith.constant 0 : index
    %c0_14 = arith.constant 0 : index
    %13 = vector.load %arg7[%c0_12, %c0_13, %c0_14] : memref<1x1x8xf32, #tpu.memory_space<vmem>>, vector<1x1x8xf32>
    %14 = vector.shape_cast %13 : vector<1x1x8xf32> to vector<1x8xf32>
    %15 = vector.broadcast %12 : vector<8x1xf32> to vector<8x8xf32>
    %16 = vector.broadcast %14 : vector<1x8xf32> to vector<8x8xf32>
    %17 = arith.addf %15, %16 : vector<8x8xf32>
    %18 = vector.extract_strided_slice %6 {offsets = [0, 0], sizes = [8, 32], strides = [1, 1]} : vector<8x128xf32> to vector<8x32xf32>
    %19 = vector.extract_strided_slice %8 {offsets = [0, 0], sizes = [8, 32], strides = [1, 1]} : vector<8x128xf32> to vector<8x32xf32>
    %cst_15 = arith.constant dense<0.000000e+00> : vector<8x8xf32>
    %20 = tpu.matmul %18, %19, %cst_15 {dimension_numbers = #tpu.dot_dimension_numbers<[1], [1], [0], [0], [0, 0, 1, 0], [], []>} : vector<8x32xf32>, vector<8x32xf32>, vector<8x8xf32> -> vector<8x8xf32>
    %21 = arith.addf %20, %17 : vector<8x8xf32>
    %c0_16 = arith.constant 0 : index
    %c0_17 = arith.constant 0 : index
    %c0_18 = arith.constant 0 : index
    %22 = vector.load %arg9[%c0_16, %c0_17, %c0_18] : memref<4x8x1xf32, #tpu.memory_space<vmem>>, vector<1x8x1xf32>
    %23 = vector.shape_cast %22 : vector<1x8x1xf32> to vector<8x1xf32>
    %cst_19 = arith.constant dense<0xFF800000> : vector<8xf32>
    %24 = vector.multi_reduction <maximumf>, %21, %cst_19 [1] : vector<8x8xf32> to vector<8xf32>
    %25 = vector.shape_cast %24 : vector<8xf32> to vector<8x1xf32>
    %26 = arith.maximumf %23, %25 : vector<8x1xf32>
    %27 = arith.subf %23, %26 : vector<8x1xf32>
    %28 = math.exp %27 : vector<8x1xf32>
    %29 = vector.broadcast %26 : vector<8x1xf32> to vector<8x8xf32>
    %30 = arith.subf %21, %29 : vector<8x8xf32>
    %31 = math.exp %30 : vector<8x8xf32>
    %c0_20 = arith.constant 0 : index
    %c0_21 = arith.constant 0 : index
    %c0_22 = arith.constant 0 : index
    %32 = vector.load %arg10[%c0_20, %c0_21, %c0_22] : memref<4x8x1xf32, #tpu.memory_space<vmem>>, vector<1x8x1xf32>
    %33 = vector.shape_cast %32 : vector<1x8x1xf32> to vector<8x1xf32>
    %34 = arith.mulf %28, %33 : vector<8x1xf32>
    %cst_23 = arith.constant dense<0.000000e+00> : vector<8xf32>
    %35 = vector.multi_reduction <add>, %31, %cst_23 [1] : vector<8x8xf32> to vector<8xf32>
    %36 = vector.shape_cast %35 : vector<8xf32> to vector<8x1xf32>
    %37 = arith.addf %34, %36 : vector<8x1xf32>
    %c0_24 = arith.constant 0 : index
    %c0_25 = arith.constant 0 : index
    %c0_26 = arith.constant 0 : index
    %38 = vector.load %arg10[%c0_24, %c0_25, %c0_26] : memref<4x8x1xf32, #tpu.memory_space<vmem>>, vector<1x8x1xf32>
    %39 = vector.shape_cast %38 : vector<1x8x1xf32> to vector<8x1xf32>
    %40 = vector.shape_cast %37 : vector<8x1xf32> to vector<1x8x1xf32>
    tpu.vector_store %arg10[%c0_24, %c0_25, %c0_26], %40 {strides = array<i32>} : memref<4x8x1xf32, #tpu.memory_space<vmem>>, vector<1x8x1xf32>,
    %c0_27 = arith.constant 0 : index
    %c0_28 = arith.constant 0 : index
    %c0_29 = arith.constant 0 : index
    %41 = vector.load %arg9[%c0_27, %c0_28, %c0_29] : memref<4x8x1xf32, #tpu.memory_space<vmem>>, vector<1x8x1xf32>
    %42 = vector.shape_cast %41 : vector<1x8x1xf32> to vector<8x1xf32>
    %43 = vector.shape_cast %26 : vector<8x1xf32> to vector<1x8x1xf32>
    tpu.vector_store %arg9[%c0_27, %c0_28, %c0_29], %43 {strides = array<i32>} : memref<4x8x1xf32, #tpu.memory_space<vmem>>, vector<1x8x1xf32>,
    %c0_30 = arith.constant 0 : index
    %c0_31 = arith.constant 0 : index
    %44 = vector.load %arg11[%c0_30, %c0_31] : memref<8x128xf32, #tpu.memory_space<vmem>>, vector<8x32xf32>
    %45 = vector.broadcast %28 : vector<8x1xf32> to vector<8x32xf32>
    %46 = arith.mulf %45, %44 : vector<8x32xf32>
    %47 = vector.extract_strided_slice %10 {offsets = [0, 0], sizes = [8, 32], strides = [1, 1]} : vector<8x128xf32> to vector<8x32xf32>
    %cst_32 = arith.constant dense<0.000000e+00> : vector<8x32xf32>
    %48 = tpu.matmul %31, %47, %cst_32 {dimension_numbers = #tpu.dot_dimension_numbers<[1], [0], [0], [1], [0, 0, 1, 1], [], []>} : vector<8x8xf32>, vector<8x32xf32>, vector<8x32xf32> -> vector<8x32xf32>
    %49 = arith.addf %46, %48 : vector<8x32xf32>
    %c0_33 = arith.constant 0 : index
    %c0_34 = arith.constant 0 : index
    %50 = vector.load %arg11[%c0_33, %c0_34] : memref<8x128xf32, #tpu.memory_space<vmem>>, vector<8x32xf32>
    tpu.vector_store %arg11[%c0_33, %c0_34], %49 {strides = array<i32>} : memref<8x128xf32, #tpu.memory_space<vmem>>, vector<8x32xf32>,
    %51 = vector.extract_strided_slice %6 {offsets = [0, 32], sizes = [8, 32], strides = [1, 1]} : vector<8x128xf32> to vector<8x32xf32>
    %52 = vector.extract_strided_slice %8 {offsets = [0, 32], sizes = [8, 32], strides = [1, 1]} : vector<8x128xf32> to vector<8x32xf32>
    %cst_35 = arith.constant dense<0.000000e+00> : vector<8x8xf32>
    %53 = tpu.matmul %51, %52, %cst_35 {dimension_numbers = #tpu.dot_dimension_numbers<[1], [1], [0], [0], [0, 0, 1, 0], [], []>} : vector<8x32xf32>, vector<8x32xf32>, vector<8x8xf32> -> vector<8x8xf32>
    %54 = arith.addf %53, %17 : vector<8x8xf32>
    %c1 = arith.constant 1 : index
    %c0_36 = arith.constant 0 : index
    %c0_37 = arith.constant 0 : index
    %55 = vector.load %arg9[%c1, %c0_36, %c0_37] : memref<4x8x1xf32, #tpu.memory_space<vmem>>, vector<1x8x1xf32>
    %56 = vector.shape_cast %55 : vector<1x8x1xf32> to vector<8x1xf32>
    %cst_38 = arith.constant dense<0xFF800000> : vector<8xf32>
    %57 = vector.multi_reduction <maximumf>, %54, %cst_38 [1] : vector<8x8xf32> to vector<8xf32>
    %58 = vector.shape_cast %57 : vector<8xf32> to vector<8x1xf32>
    %59 = arith.maximumf %56, %58 : vector<8x1xf32>
    %60 = arith.subf %56, %59 : vector<8x1xf32>
    %61 = math.exp %60 : vector<8x1xf32>
    %62 = vector.broadcast %59 : vector<8x1xf32> to vector<8x8xf32>
    %63 = arith.subf %54, %62 : vector<8x8xf32>
    %64 = math.exp %63 : vector<8x8xf32>
    %c1_39 = arith.constant 1 : index
    %c0_40 = arith.constant 0 : index
    %c0_41 = arith.constant 0 : index
    %65 = vector.load %arg10[%c1_39, %c0_40, %c0_41] : memref<4x8x1xf32, #tpu.memory_space<vmem>>, vector<1x8x1xf32>
    %66 = vector.shape_cast %65 : vector<1x8x1xf32> to vector<8x1xf32>
    %67 = arith.mulf %61, %66 : vector<8x1xf32>
    %cst_42 = arith.constant dense<0.000000e+00> : vector<8xf32>
    %68 = vector.multi_reduction <add>, %64, %cst_42 [1] : vector<8x8xf32> to vector<8xf32>
    %69 = vector.shape_cast %68 : vector<8xf32> to vector<8x1xf32>
    %70 = arith.addf %67, %69 : vector<8x1xf32>
    %c1_43 = arith.constant 1 : index
    %c0_44 = arith.constant 0 : index
    %c0_45 = arith.constant 0 : index
    %71 = vector.load %arg10[%c1_43, %c0_44, %c0_45] : memref<4x8x1xf32, #tpu.memory_space<vmem>>, vector<1x8x1xf32>
    %72 = vector.shape_cast %71 : vector<1x8x1xf32> to vector<8x1xf32>
    %73 = vector.shape_cast %70 : vector<8x1xf32> to vector<1x8x1xf32>
    tpu.vector_store %arg10[%c1_43, %c0_44, %c0_45], %73 {strides = array<i32>} : memref<4x8x1xf32, #tpu.memory_space<vmem>>, vector<1x8x1xf32>,
    %c1_46 = arith.constant 1 : index
    %c0_47 = arith.constant 0 : index
    %c0_48 = arith.constant 0 : index
    %74 = vector.load %arg9[%c1_46, %c0_47, %c0_48] : memref<4x8x1xf32, #tpu.memory_space<vmem>>, vector<1x8x1xf32>
    %75 = vector.shape_cast %74 : vector<1x8x1xf32> to vector<8x1xf32>
    %76 = vector.shape_cast %59 : vector<8x1xf32> to vector<1x8x1xf32>
    tpu.vector_store %arg9[%c1_46, %c0_47, %c0_48], %76 {strides = array<i32>} : memref<4x8x1xf32, #tpu.memory_space<vmem>>, vector<1x8x1xf32>,
    %c0_49 = arith.constant 0 : index
    %c32 = arith.constant 32 : index
    %77 = vector.load %arg11[%c0_49, %c32] : memref<8x128xf32, #tpu.memory_space<vmem>>, vector<8x32xf32>
    %78 = vector.broadcast %61 : vector<8x1xf32> to vector<8x32xf32>
    %79 = arith.mulf %78, %77 : vector<8x32xf32>
    %80 = vector.extract_strided_slice %10 {offsets = [0, 32], sizes = [8, 32], strides = [1, 1]} : vector<8x128xf32> to vector<8x32xf32>
    %cst_50 = arith.constant dense<0.000000e+00> : vector<8x32xf32>
    %81 = tpu.matmul %64, %80, %cst_50 {dimension_numbers = #tpu.dot_dimension_numbers<[1], [0], [0], [1], [0, 0, 1, 1], [], []>} : vector<8x8xf32>, vector<8x32xf32>, vector<8x32xf32> -> vector<8x32xf32>
    %82 = arith.addf %79, %81 : vector<8x32xf32>
    %c0_51 = arith.constant 0 : index
    %c32_52 = arith.constant 32 : index
    %83 = vector.load %arg11[%c0_51, %c32_52] : memref<8x128xf32, #tpu.memory_space<vmem>>, vector<8x32xf32>
    tpu.vector_store %arg11[%c0_51, %c32_52], %82 {strides = array<i32>} : memref<8x128xf32, #tpu.memory_space<vmem>>, vector<8x32xf32>,
    %84 = vector.extract_strided_slice %6 {offsets = [0, 64], sizes = [8, 32], strides = [1, 1]} : vector<8x128xf32> to vector<8x32xf32>
    %85 = vector.extract_strided_slice %8 {offsets = [0, 64], sizes = [8, 32], strides = [1, 1]} : vector<8x128xf32> to vector<8x32xf32>
    %cst_53 = arith.constant dense<0.000000e+00> : vector<8x8xf32>
    %86 = tpu.matmul %84, %85, %cst_53 {dimension_numbers = #tpu.dot_dimension_numbers<[1], [1], [0], [0], [0, 0, 1, 0], [], []>} : vector<8x32xf32>, vector<8x32xf32>, vector<8x8xf32> -> vector<8x8xf32>
    %87 = arith.addf %86, %17 : vector<8x8xf32>
    %c2 = arith.constant 2 : index
    %c0_54 = arith.constant 0 : index
    %c0_55 = arith.constant 0 : index
    %88 = vector.load %arg9[%c2, %c0_54, %c0_55] : memref<4x8x1xf32, #tpu.memory_space<vmem>>, vector<1x8x1xf32>
    %89 = vector.shape_cast %88 : vector<1x8x1xf32> to vector<8x1xf32>
    %cst_56 = arith.constant dense<0xFF800000> : vector<8xf32>
    %90 = vector.multi_reduction <maximumf>, %87, %cst_56 [1] : vector<8x8xf32> to vector<8xf32>
    %91 = vector.shape_cast %90 : vector<8xf32> to vector<8x1xf32>
    %92 = arith.maximumf %89, %91 : vector<8x1xf32>
    %93 = arith.subf %89, %92 : vector<8x1xf32>
    %94 = math.exp %93 : vector<8x1xf32>
    %95 = vector.broadcast %92 : vector<8x1xf32> to vector<8x8xf32>
    %96 = arith.subf %87, %95 : vector<8x8xf32>
    %97 = math.exp %96 : vector<8x8xf32>
    %c2_57 = arith.constant 2 : index
    %c0_58 = arith.constant 0 : index
    %c0_59 = arith.constant 0 : index
    %98 = vector.load %arg10[%c2_57, %c0_58, %c0_59] : memref<4x8x1xf32, #tpu.memory_space<vmem>>, vector<1x8x1xf32>
    %99 = vector.shape_cast %98 : vector<1x8x1xf32> to vector<8x1xf32>
    %100 = arith.mulf %94, %99 : vector<8x1xf32>
    %cst_60 = arith.constant dense<0.000000e+00> : vector<8xf32>
    %101 = vector.multi_reduction <add>, %97, %cst_60 [1] : vector<8x8xf32> to vector<8xf32>
    %102 = vector.shape_cast %101 : vector<8xf32> to vector<8x1xf32>
    %103 = arith.addf %100, %102 : vector<8x1xf32>
    %c2_61 = arith.constant 2 : index
    %c0_62 = arith.constant 0 : index
    %c0_63 = arith.constant 0 : index
    %104 = vector.load %arg10[%c2_61, %c0_62, %c0_63] : memref<4x8x1xf32, #tpu.memory_space<vmem>>, vector<1x8x1xf32>
    %105 = vector.shape_cast %104 : vector<1x8x1xf32> to vector<8x1xf32>
    %106 = vector.shape_cast %103 : vector<8x1xf32> to vector<1x8x1xf32>
    tpu.vector_store %arg10[%c2_61, %c0_62, %c0_63], %106 {strides = array<i32>} : memref<4x8x1xf32, #tpu.memory_space<vmem>>, vector<1x8x1xf32>,
    %c2_64 = arith.constant 2 : index
    %c0_65 = arith.constant 0 : index
    %c0_66 = arith.constant 0 : index
    %107 = vector.load %arg9[%c2_64, %c0_65, %c0_66] : memref<4x8x1xf32, #tpu.memory_space<vmem>>, vector<1x8x1xf32>
    %108 = vector.shape_cast %107 : vector<1x8x1xf32> to vector<8x1xf32>
    %109 = vector.shape_cast %92 : vector<8x1xf32> to vector<1x8x1xf32>
    tpu.vector_store %arg9[%c2_64, %c0_65, %c0_66], %109 {strides = array<i32>} : memref<4x8x1xf32, #tpu.memory_space<vmem>>, vector<1x8x1xf32>,
    %c0_67 = arith.constant 0 : index
    %c64 = arith.constant 64 : index
    %110 = vector.load %arg11[%c0_67, %c64] : memref<8x128xf32, #tpu.memory_space<vmem>>, vector<8x32xf32>
    %111 = vector.broadcast %94 : vector<8x1xf32> to vector<8x32xf32>
    %112 = arith.mulf %111, %110 : vector<8x32xf32>
    %113 = vector.extract_strided_slice %10 {offsets = [0, 64], sizes = [8, 32], strides = [1, 1]} : vector<8x128xf32> to vector<8x32xf32>
    %cst_68 = arith.constant dense<0.000000e+00> : vector<8x32xf32>
    %114 = tpu.matmul %97, %113, %cst_68 {dimension_numbers = #tpu.dot_dimension_numbers<[1], [0], [0], [1], [0, 0, 1, 1], [], []>} : vector<8x8xf32>, vector<8x32xf32>, vector<8x32xf32> -> vector<8x32xf32>
    %115 = arith.addf %112, %114 : vector<8x32xf32>
    %c0_69 = arith.constant 0 : index
    %c64_70 = arith.constant 64 : index
    %116 = vector.load %arg11[%c0_69, %c64_70] : memref<8x128xf32, #tpu.memory_space<vmem>>, vector<8x32xf32>
    tpu.vector_store %arg11[%c0_69, %c64_70], %115 {strides = array<i32>} : memref<8x128xf32, #tpu.memory_space<vmem>>, vector<8x32xf32>,
    %117 = vector.extract_strided_slice %6 {offsets = [0, 96], sizes = [8, 32], strides = [1, 1]} : vector<8x128xf32> to vector<8x32xf32>
    %118 = vector.extract_strided_slice %8 {offsets = [0, 96], sizes = [8, 32], strides = [1, 1]} : vector<8x128xf32> to vector<8x32xf32>
    %cst_71 = arith.constant dense<0.000000e+00> : vector<8x8xf32>
    %119 = tpu.matmul %117, %118, %cst_71 {dimension_numbers = #tpu.dot_dimension_numbers<[1], [1], [0], [0], [0, 0, 1, 0], [], []>} : vector<8x32xf32>, vector<8x32xf32>, vector<8x8xf32> -> vector<8x8xf32>
    %120 = arith.addf %119, %17 : vector<8x8xf32>
    %c3 = arith.constant 3 : index
    %c0_72 = arith.constant 0 : index
    %c0_73 = arith.constant 0 : index
    %121 = vector.load %arg9[%c3, %c0_72, %c0_73] : memref<4x8x1xf32, #tpu.memory_space<vmem>>, vector<1x8x1xf32>
    %122 = vector.shape_cast %121 : vector<1x8x1xf32> to vector<8x1xf32>
    %cst_74 = arith.constant dense<0xFF800000> : vector<8xf32>
    %123 = vector.multi_reduction <maximumf>, %120, %cst_74 [1] : vector<8x8xf32> to vector<8xf32>
    %124 = vector.shape_cast %123 : vector<8xf32> to vector<8x1xf32>
    %125 = arith.maximumf %122, %124 : vector<8x1xf32>
    %126 = arith.subf %122, %125 : vector<8x1xf32>
    %127 = math.exp %126 : vector<8x1xf32>
    %128 = vector.broadcast %125 : vector<8x1xf32> to vector<8x8xf32>
    %129 = arith.subf %120, %128 : vector<8x8xf32>
    %130 = math.exp %129 : vector<8x8xf32>
    %c3_75 = arith.constant 3 : index
    %c0_76 = arith.constant 0 : index
    %c0_77 = arith.constant 0 : index
    %131 = vector.load %arg10[%c3_75, %c0_76, %c0_77] : memref<4x8x1xf32, #tpu.memory_space<vmem>>, vector<1x8x1xf32>
    %132 = vector.shape_cast %131 : vector<1x8x1xf32> to vector<8x1xf32>
    %133 = arith.mulf %127, %132 : vector<8x1xf32>
    %cst_78 = arith.constant dense<0.000000e+00> : vector<8xf32>
    %134 = vector.multi_reduction <add>, %130, %cst_78 [1] : vector<8x8xf32> to vector<8xf32>
    %135 = vector.shape_cast %134 : vector<8xf32> to vector<8x1xf32>
    %136 = arith.addf %133, %135 : vector<8x1xf32>
    %c3_79 = arith.constant 3 : index
    %c0_80 = arith.constant 0 : index
    %c0_81 = arith.constant 0 : index
    %137 = vector.load %arg10[%c3_79, %c0_80, %c0_81] : memref<4x8x1xf32, #tpu.memory_space<vmem>>, vector<1x8x1xf32>
    %138 = vector.shape_cast %137 : vector<1x8x1xf32> to vector<8x1xf32>
    %139 = vector.shape_cast %136 : vector<8x1xf32> to vector<1x8x1xf32>
    tpu.vector_store %arg10[%c3_79, %c0_80, %c0_81], %139 {strides = array<i32>} : memref<4x8x1xf32, #tpu.memory_space<vmem>>, vector<1x8x1xf32>,
    %c3_82 = arith.constant 3 : index
    %c0_83 = arith.constant 0 : index
    %c0_84 = arith.constant 0 : index
    %140 = vector.load %arg9[%c3_82, %c0_83, %c0_84] : memref<4x8x1xf32, #tpu.memory_space<vmem>>, vector<1x8x1xf32>
    %141 = vector.shape_cast %140 : vector<1x8x1xf32> to vector<8x1xf32>
    %142 = vector.shape_cast %125 : vector<8x1xf32> to vector<1x8x1xf32>
    tpu.vector_store %arg9[%c3_82, %c0_83, %c0_84], %142 {strides = array<i32>} : memref<4x8x1xf32, #tpu.memory_space<vmem>>, vector<1x8x1xf32>,
    %c0_85 = arith.constant 0 : index
    %c96 = arith.constant 96 : index
    %143 = vector.load %arg11[%c0_85, %c96] : memref<8x128xf32, #tpu.memory_space<vmem>>, vector<8x32xf32>
    %144 = vector.broadcast %127 : vector<8x1xf32> to vector<8x32xf32>
    %145 = arith.mulf %144, %143 : vector<8x32xf32>
    %146 = vector.extract_strided_slice %10 {offsets = [0, 96], sizes = [8, 32], strides = [1, 1]} : vector<8x128xf32> to vector<8x32xf32>
    %cst_86 = arith.constant dense<0.000000e+00> : vector<8x32xf32>
    %147 = tpu.matmul %130, %146, %cst_86 {dimension_numbers = #tpu.dot_dimension_numbers<[1], [0], [0], [1], [0, 0, 1, 1], [], []>} : vector<8x8xf32>, vector<8x32xf32>, vector<8x32xf32> -> vector<8x32xf32>
    %148 = arith.addf %145, %147 : vector<8x32xf32>
    %c0_87 = arith.constant 0 : index
    %c96_88 = arith.constant 96 : index
    %149 = vector.load %arg11[%c0_87, %c96_88] : memref<8x128xf32, #tpu.memory_space<vmem>>, vector<8x32xf32>
    tpu.vector_store %arg11[%c0_87, %c96_88], %148 {strides = array<i32>} : memref<8x128xf32, #tpu.memory_space<vmem>>, vector<8x32xf32>,
    %c0_i32_89 = arith.constant 0 : i32
    %150 = arith.cmpi eq, %arg2, %c0_i32_89 : i32
    %151 = arith.extui %150 : i1 to i32
    %c0_i32_90 = arith.constant 0 : i32
    %152 = arith.cmpi ne, %151, %c0_i32_90 : i32
    scf.if %152 {
      %c0_91 = arith.constant 0 : index
      %c0_92 = arith.constant 0 : index
      %153 = vector.load %arg11[%c0_91, %c0_92] : memref<8x128xf32, #tpu.memory_space<vmem>>, vector<8x32xf32>
      %c0_93 = arith.constant 0 : index
      %c0_94 = arith.constant 0 : index
      %c0_95 = arith.constant 0 : index
      %154 = vector.load %arg10[%c0_93, %c0_94, %c0_95] : memref<4x8x1xf32, #tpu.memory_space<vmem>>, vector<1x8x1xf32>
      %155 = vector.shape_cast %154 : vector<1x8x1xf32> to vector<8x1xf32>
      %156 = tpu.reciprocal %155 {approx = true} : vector<8x1xf32> -> vector<8x1xf32>
      %157 = vector.broadcast %156 : vector<8x1xf32> to vector<8x32xf32>
      %158 = arith.mulf %153, %157 : vector<8x32xf32>
      %c0_96 = arith.constant 0 : index
      %c0_97 = arith.constant 0 : index
      %159 = vector.load %arg11[%c0_96, %c0_97] : memref<8x128xf32, #tpu.memory_space<vmem>>, vector<8x32xf32>
      tpu.vector_store %arg11[%c0_96, %c0_97], %158 {strides = array<i32>} : memref<8x128xf32, #tpu.memory_space<vmem>>, vector<8x32xf32>,
      %c0_98 = arith.constant 0 : index
      %c32_99 = arith.constant 32 : index
      %160 = vector.load %arg11[%c0_98, %c32_99] : memref<8x128xf32, #tpu.memory_space<vmem>>, vector<8x32xf32>
      %c1_100 = arith.constant 1 : index
      %c0_101 = arith.constant 0 : index
      %c0_102 = arith.constant 0 : index
      %161 = vector.load %arg10[%c1_100, %c0_101, %c0_102] : memref<4x8x1xf32, #tpu.memory_space<vmem>>, vector<1x8x1xf32>
      %162 = vector.shape_cast %161 : vector<1x8x1xf32> to vector<8x1xf32>
      %163 = tpu.reciprocal %162 {approx = true} : vector<8x1xf32> -> vector<8x1xf32>
      %164 = vector.broadcast %163 : vector<8x1xf32> to vector<8x32xf32>
      %165 = arith.mulf %160, %164 : vector<8x32xf32>
      %c0_103 = arith.constant 0 : index
      %c32_104 = arith.constant 32 : index
      %166 = vector.load %arg11[%c0_103, %c32_104] : memref<8x128xf32, #tpu.memory_space<vmem>>, vector<8x32xf32>
      tpu.vector_store %arg11[%c0_103, %c32_104], %165 {strides = array<i32>} : memref<8x128xf32, #tpu.memory_space<vmem>>, vector<8x32xf32>,
      %c0_105 = arith.constant 0 : index
      %c64_106 = arith.constant 64 : index
      %167 = vector.load %arg11[%c0_105, %c64_106] : memref<8x128xf32, #tpu.memory_space<vmem>>, vector<8x32xf32>
      %c2_107 = arith.constant 2 : index
      %c0_108 = arith.constant 0 : index
      %c0_109 = arith.constant 0 : index
      %168 = vector.load %arg10[%c2_107, %c0_108, %c0_109] : memref<4x8x1xf32, #tpu.memory_space<vmem>>, vector<1x8x1xf32>
      %169 = vector.shape_cast %168 : vector<1x8x1xf32> to vector<8x1xf32>
      %170 = tpu.reciprocal %169 {approx = true} : vector<8x1xf32> -> vector<8x1xf32>
      %171 = vector.broadcast %170 : vector<8x1xf32> to vector<8x32xf32>
      %172 = arith.mulf %167, %171 : vector<8x32xf32>
      %c0_110 = arith.constant 0 : index
      %c64_111 = arith.constant 64 : index
      %173 = vector.load %arg11[%c0_110, %c64_111] : memref<8x128xf32, #tpu.memory_space<vmem>>, vector<8x32xf32>
      tpu.vector_store %arg11[%c0_110, %c64_111], %172 {strides = array<i32>} : memref<8x128xf32, #tpu.memory_space<vmem>>, vector<8x32xf32>,
      %c0_112 = arith.constant 0 : index
      %c96_113 = arith.constant 96 : index
      %174 = vector.load %arg11[%c0_112, %c96_113] : memref<8x128xf32, #tpu.memory_space<vmem>>, vector<8x32xf32>
      %c3_114 = arith.constant 3 : index
      %c0_115 = arith.constant 0 : index
      %c0_116 = arith.constant 0 : index
      %175 = vector.load %arg10[%c3_114, %c0_115, %c0_116] : memref<4x8x1xf32, #tpu.memory_space<vmem>>, vector<1x8x1xf32>
      %176 = vector.shape_cast %175 : vector<1x8x1xf32> to vector<8x1xf32>
      %177 = tpu.reciprocal %176 {approx = true} : vector<8x1xf32> -> vector<8x1xf32>
      %178 = vector.broadcast %177 : vector<8x1xf32> to vector<8x32xf32>
      %179 = arith.mulf %174, %178 : vector<8x32xf32>
      %c0_117 = arith.constant 0 : index
      %c96_118 = arith.constant 96 : index
      %180 = vector.load %arg11[%c0_117, %c96_118] : memref<8x128xf32, #tpu.memory_space<vmem>>, vector<8x32xf32>
      tpu.vector_store %arg11[%c0_117, %c96_118], %179 {strides = array<i32>} : memref<8x128xf32, #tpu.memory_space<vmem>>, vector<8x32xf32>,
      %c0_119 = arith.constant 0 : index
      %c0_120 = arith.constant 0 : index
      %181 = vector.load %arg11[%c0_119, %c0_120] : memref<8x128xf32, #tpu.memory_space<vmem>>, vector<8x128xf32>
      %c0_121 = arith.constant 0 : index
      %c0_122 = arith.constant 0 : index
      %c0_123 = arith.constant 0 : index
      %182 = vector.load %arg8[%c0_121, %c0_122, %c0_123] : memref<1x8x128xf32, #tpu.memory_space<vmem>>, vector<1x8x128xf32>
      %183 = vector.shape_cast %182 : vector<1x8x128xf32> to vector<8x128xf32>
      %184 = vector.shape_cast %181 : vector<8x128xf32> to vector<1x8x128xf32>
      tpu.vector_store %arg8[%c0_121, %c0_122, %c0_123], %184 {strides = array<i32>} : memref<1x8x128xf32, #tpu.memory_space<vmem>>, vector<1x8x128xf32>,
    } else {
    }
    return
  }
  func.func @transform_0(%arg0: i32, %arg1: i32, %arg2: i32) -> (i32, i32, i32) {
    %c0_i32 = arith.constant 0 : i32
    %c0_i32_0 = arith.constant 0 : i32
    return %arg0, %arg1, %c0_i32 : i32, i32, i32
  }
  func.func @transform_1(%arg0: i32, %arg1: i32, %arg2: i32) -> (i32, i32, i32) {
    %c0_i32 = arith.constant 0 : i32
    %c0_i32_0 = arith.constant 0 : i32
    return %arg0, %arg2, %c0_i32 : i32, i32, i32
  }
  func.func @transform_2(%arg0: i32, %arg1: i32, %arg2: i32) -> (i32, i32, i32) {
    %c0_i32 = arith.constant 0 : i32
    %c0_i32_0 = arith.constant 0 : i32
    return %arg0, %arg2, %c0_i32 : i32, i32, i32
  }
  func.func @transform_3(%arg0: i32, %arg1: i32, %arg2: i32) -> (i32, i32, i32) {
    %c0_i32 = arith.constant 0 : i32
    %c0_i32_0 = arith.constant 0 : i32
    return %arg0, %arg1, %c0_i32 : i32, i32, i32
  }
  func.func @transform_4(%arg0: i32, %arg1: i32, %arg2: i32) -> (i32, i32, i32) {
    %c0_i32 = arith.constant 0 : i32
    %c0_i32_0 = arith.constant 0 : i32
    return %arg0, %c0_i32, %arg2 : i32, i32, i32
  }
  func.func @transform_5(%arg0: i32, %arg1: i32, %arg2: i32) -> (i32, i32, i32) {
    %c0_i32 = arith.constant 0 : i32
    %c0_i32_0 = arith.constant 0 : i32
    return %arg0, %arg1, %c0_i32 : i32, i32, i32
  }
}

</mosaic_0001>

<bundles_post_ra>
// kernel: tpu_custom_call.1
= control target key start
LH: loop header
LB: loop body
LE: loop exit
PB: predicated region body
PF: predicated region fallthrough
CT: control target
= control target key end

     0   :  { %10 = vsyncpa [#allocation6], 0  ;;  %s2114_s0 = inlined_call_operand.vmem [shape: f32[2,8,128], index: 0, kind: input, shape index: {}]   ;;  %s2115_s1 = inlined_call_operand.hbm [shape: f32[2,8,128], index: 1, kind: input, shape index: {}]   ;;  %s2116_s2 = inlined_call_operand.hbm [shape: f32[2,8,128], index: 2, kind: input, shape index: {}]   ;;  %s2117_s3 = inlined_call_operand.vmem [shape: f32[2,8,1], index: 3, kind: input, shape index: {}]   ;;  %s2118_s4 = inlined_call_operand.vmem [shape: f32[2,1,8], index: 4, kind: input, shape index: {}]   ;;  %s2119_s5 = inlined_call_operand.hbm [shape: f32[2,8,128], index: 5, kind: output, shape index: {}]  }
   0x1   :  { %12 = vsyncpa [#allocation6 + $0x1], 0 }
   0x2   :  { %13 = vsyncpa [#allocation9], 0 }
   0x3   :  { %15 = vsyncpa [#allocation9 + $0x1], 0 }
   0x4   :  { %16 = vsyncpa [#allocation7], 0 }
   0x5   :  { %18 = vsyncpa [#allocation7 + $0x1], 0  ;;  %s1769_s18 = smov 0   ;;  %s1771_s19 = smov 0  }
   0x6   :  { %s1773_s20 = smov 0   ;;  %s1775_s21 = smov 0  }
   0x7   :  { %s1777_s22 = smov 0   ;;  %s1779_s23 = smov 0  }
   0x8 LB: > { %s1394_s24 = sadd.s32 4294967295, %s1727_s23   ;;  %s1395_s25 = sadd.s32 4294967294, %s1727_s23   ;;  %s1727_s23 = sphi %s1779_s23, %s24_s23   ;;  %s1723_s22 = sphi %s1777_s22, %s2139_s22   ;;  %s1719_s21 = sphi %s1775_s21, %s2138_s21   ;;  %s1715_s20 = sphi %s1773_s20, %s2137_s20   ;;  %s1711_s19 = sphi %s1771_s19, %s2136_s19   ;;  %s1707_s18 = sphi %s1769_s18, %s2135_s18  }
   0x9   : > { %s43_s26 = sadd.s32 1, %s1723_s22  ;;  %s80_s27 = sadd.s32 1, %s1715_s20 }
   0xa   : > { %p45_p0 = scmp.ge.s32.totalorder %s43_s26, 2  ;;  %p87_p1 = scmp.ne.s32.totalorder %s1715_s20, %s1711_s19 }
   0xb   : > { %p88_p2 = scmp.eq.s32.totalorder %s1727_s23, 0  ;;  %p93_p3 = scmp.ne.s32.totalorder %s1711_s19, %s1707_s18 }
   0xc   : > { %s2141_s26 = smov (%p45_p0, %s43_s26), 0  ;;  %p94_p5 = scmp.eq.s32.totalorder %s1394_s24, 0 }
   0xd   : > { %p1810_p4 = por %p88_p2, %p87_p1  ;;  %s75_s29 = ssub.s32 %s1723_s22, %s2141_s26 }
   0xe   : > { %p203_p6 = scmp.eq.s32.totalorder %s1394_s24, 1  ;;  %p78_p7 = scmp.eq.s32.totalorder %s75_s29, 0 }
   0xf   : > { %p1816_p8 = por %p94_p5, %p93_p3  ;;  %p209_p10 = scmp.eq.s32.totalorder %s1395_s25, 1 }
  0x10   : > { %p1820_p9 = por %p203_p6, %p87_p1  ;;  %p1498_p13 = scmp.lt.s32.totalorder %s1727_s23, 2 }
  0x11   : > { %s2123_s30 = scalar_select %p1816_p8, 1, 0 }
  0x12   : > { %s2124_s6 = scalar_select %p1820_p9, 1, 0 }
  0x13   : > { %s1825_s7 = scalar_select %p78_p7, %s1715_s20, %s80_s27  }
  0x14   : > { %p1827_p11 = por %p209_p10, %p93_p3  ;;  %s1834_s9 = sand.u32 1, %s1715_s20  }
  0x15   : > { %s1398_s10 = sshll.u32 %s1834_s9, 3  ;;  %s1399_s11 = sshll.u32 %s1723_s22, 7 }
  0x16   : > { %s2125_s8 = scalar_select %p1827_p11, 1, 0 }
  0x17   : > { %s1843_s14 = scalar_lea.hbm %s2115_s1, %s1399_s11  ;;  %s243_s15 = scalar_lea.vmem [#allocation5], %s1398_s10 }
  0x18   : > { %s251_s16 = sshll.u32 %s243_s15, 4  ;;  %p1851_p0 = pnand %p1498_p13, %p1810_p4  ;;  %s1847_s16 = int_to_ptr.vmem [resolvable:$true] %s251_s16 }
  0x19   : > { %s240_s24 = scalar_lea.sflag [#allocation6], %s1834_s9  ;;  %s1581_s25 = scalar_lea.hbm %s1843_s14, 128 }
  0x1a   : > { %p1582_p3 = scmp.ne.s32.totalorder %s1843_s14, %s1581_s25  ;;  %p1583_p5 = pneg %p1851_p0 }
  0x1b   : > { %s1586_s28 = scalar_lea.hbm %s2115_s1, 256  ;;  %p1587_p4 = scmp.lt.u32.totalorder %s1843_s14, %s2115_s1 }
  0x1c   : > { %p1584_p6 = pnand %p1583_p5, %p1582_p3  ;;  %p1588_p10 = scmp.lt.u32.totalorder %s1586_s28, %s1581_s25 }
  0x1d   : > { %p1590_p12 = scmp.lt.u32.totalorder %s1581_s25, %s1843_s14 }
  0x1e   : > { %p1585_p7 = pneg %p1584_p6  ;;  %p1589_p13 = por %p1588_p10, %p1587_p4 }
  0x20   : > { %p1591_p1 = por %p1590_p12, %p1589_p13 }
  0x22   : > { %p1592_p2 = pnand %p1591_p1, %p1585_p7 }
  0x24   : > { %1595 = shalt.err (!%p1592_p2)
}
  0x25   : > { %s1596_s15 = scalar_lea.vmem %s1847_s16, 128  ;;  %s1729_s27 = smov [#allocation5]  }
  0x26   : > { %p1597_p3 = scmp.ne.s32.totalorder %s1847_s16, %s1596_s15  ;;  %s1601_s29 = sshll.u32 %s1729_s27, 4  ;;  %s1602_s29 = int_to_ptr.vmem [resolvable:$false] %s1601_s29 }
  0x27   : > { %s1603_s12 = scalar_lea.vmem %s1602_s29, 256  ;;  %p1604_p9 = scmp.lt.s32.totalorder %s1847_s16, %s1602_s29 }
  0x28   : > { %p1599_p6 = pnand %p1597_p3, %p1583_p5  ;;  %p1605_p4 = scmp.lt.s32.totalorder %s1603_s12, %s1596_s15 }
  0x2a   : > { %p1600_p11 = pneg %p1599_p6  ;;  %p1606_p10 = por %p1605_p4, %p1604_p9 }
  0x2c   : > { %p1607_p12 = pnand %p1606_p10, %p1600_p11 }
  0x2e   : > { %1610 = shalt.err (!%p1607_p12)
}
  0x2f   : > { %1490 = dma.hbm_to_vmem [thread:$0]  (!%p1851_p0), %s1843_s14, 128, %s1847_s16, %s240_s24  }
  0x30   : > { %p2127_p1 = scmp.lt.s32.totalorder %s1727_s23, 3  ;;  %p2128_p2 = scmp.ge.s32.totalorder %s1727_s23, 1 }
  0x31   : > { %s1896_s15 = scalar_lea.hbm %s2116_s2, %s1399_s11  ;;  %s262_s27 = scalar_lea.vmem [#allocation8], %s1398_s10 }
  0x32   : > { %p1887_p7 = pnand %p2128_p2, %p2127_p1  ;;  %s270_s29 = sshll.u32 %s262_s27, 4  ;;  %s271_s29 = int_to_ptr.vmem [resolvable:$true] %s270_s29 }
  0x33   : > { %s259_s14 = scalar_lea.sflag [#allocation9], %s1834_s9  ;;  %s1611_s16 = scalar_lea.hbm %s1896_s15, 128 }
  0x34   : > { %s2129_s25 = scalar_select %p1887_p7, 1, 0 }
  0x35   : > { %p1612_p9 = scmp.ne.s32.totalorder %s1896_s15, %s1611_s16  ;;  %s1616_s11 = scalar_lea.hbm %s2116_s2, 256 }
  0x36   : > { %p1617_p3 = scmp.lt.u32.totalorder %s1896_s15, %s2116_s2  ;;  %p1618_p6 = scmp.lt.u32.totalorder %s1616_s11, %s1611_s16 }
  0x37   : > { %p1614_p11 = pnand %p1612_p9, %p1583_p5  ;;  %p1620_p10 = scmp.lt.u32.totalorder %s1611_s16, %s1896_s15 }
  0x38   : > { %p1619_p4 = por %p1618_p6, %p1617_p3 }
  0x39   : > { %p1615_p13 = pneg %p1614_p11 }
  0x3a   : > { %p1621_p12 = por %p1620_p10, %p1619_p4 }
  0x3c   : > { %p1622_p1 = pnand %p1621_p12, %p1615_p13 }
  0x3e   : > { %1625 = shalt.err (!%p1622_p1)
}
  0x3f   : > { %s1626_s9 = scalar_lea.vmem %s271_s29, 128  ;;  %s1730_s10 = smov [#allocation8]  }
  0x40   : > { %p1627_p2 = scmp.ne.s32.totalorder %s271_s29, %s1626_s9  ;;  %s1631_s27 = sshll.u32 %s1730_s10, 4  ;;  %s1632_s27 = int_to_ptr.vmem [resolvable:$false] %s1631_s27 }
  0x41   : > { %s1633_s24 = scalar_lea.vmem %s1632_s27, 256  ;;  %p1634_p8 = scmp.lt.s32.totalorder %s271_s29, %s1632_s27 }
  0x42   : > { %p1629_p9 = pnand %p1627_p2, %p1583_p5  ;;  %p1635_p7 = scmp.lt.s32.totalorder %s1633_s24, %s1626_s9 }
  0x44   : > { %p1630_p11 = pneg %p1629_p9  ;;  %p1636_p3 = por %p1635_p7, %p1634_p8 }
  0x46   : > { %p1637_p6 = pnand %p1636_p3, %p1630_p11 }
  0x48   : > { %1640 = shalt.err (!%p1637_p6)
}
  0x49   : > { %1493 = dma.hbm_to_vmem [thread:$0]  (!%p1851_p0), %s1896_s15, 128, %s271_s29, %s259_s14  }
  0x4a   : > { %p2130_p13 = scmp.ne.s32.totalorder %s2129_s25, 0 }
  0x4b   : > { %s1923_s16 = sand.u32 (!%p2130_p13), 1, %s1711_s19   ;;  %p2131_p8 = scmp.ne.s32.totalorder (!%p2130_p13), %s2123_s30, 0 }
  0x4c   : > { %298 = sbr.rel (%p2130_p13) target bundleno = 1519 (0x5ef), region = 40  ;;  %s1926_s12 = sshll.u32 (!%p2130_p13), %s1923_s16, 3 }
  0x4d   : > { %s301_s11 = scalar_lea.sflag (!%p2130_p13), [#allocation6], %s1923_s16  ;;  %s304_s28 = scalar_lea.vmem (!%p2130_p13), [#allocation5], %s1926_s12 }
  0x53   : > { %1694 = dma.done.wait (%p2131_p8), %s301_s11, 128  }
  0x54   : > { %1696 = vsyncadd (%p2131_p8), %s301_s11, 4294967168  ;;  %s310_s17 = scalar_lea.sflag [#allocation9], %s1923_s16  ;;  %s313_s25 = scalar_lea.vmem [#allocation8], %s1926_s12 }
  0x55   : > { %1698 = dma.done.wait (%p2131_p8), %s310_s17, 128  }
  0x56   : > { %1700 = vsyncadd (%p2131_p8), %s310_s17, 4294967168  ;;  %p365_p0 = scmp.lt.s32.totalorder %s1719_s21, 1  ;;  %v1731_v0 = vmov 0.0   ;;  %vm1732_vm0 = vmmov 0   ;;  %v1733_v1 = vmov 0   ;;  %vm417_vm1 = vcmask 261120  }
  0x57   : > { %1441 = vmatprep.subr.mxu0 %v1731_v0  ;;  %398 = vst [vmem:[#allocation4] sm:$0xff] %v1731_v0  ;;  %1443 = vmatprep.mubr.msk.f32.mxu0 %vm1732_vm0, %v1731_v0  ;;  %v401_v2 = vld [vmem:[%s304_s28] sm:$0xff]  ;;  %vm389_vm2 = vcmask 7168   ;;  %v1734_v6 = vmov -1e+30   ;;  %vm495_vm3 = vcmask 64512  }
  0x58   : > { %s1946_s15 = scalar_select %p365_p0, %s1719_s21, 1  ;;  %1555 = vset.pattern.permute.xlu0 %v1733_v1  ;;  %1556 = vset.pattern.permute.xlu1 %v1733_v1  ;;  %390 = vst.msk [vmem:[#allocation2] sm:$0xff] %vm389_vm2, %v1734_v6  ;;  %391 = vst.msk [vmem:[#allocation2 + $0x8] sm:$0xff] %vm389_vm2, %v1734_v6  ;;  %v1984_v18 = vld [vmem:[%s313_s25] sm:$0xff]  ;;  %vm795_vm4 = vcmask 523520   ;;  %vm989_vm5 = vcmask 785920  }
  0x59   : > { %1446 = vmatprep.subr.mxu1 %v1731_v0  ;;  %1448 = vmatprep.mubr.msk.f32.mxu1 %vm1732_vm0, %v1731_v0  ;;  %392 = vst.msk [vmem:[#allocation2 + $0x10] sm:$0xff] %vm389_vm2, %v1734_v6  ;;  %393 = vst.msk [vmem:[#allocation2 + $0x18] sm:$0xff] %vm389_vm2, %v1734_v6  ;;  %s1735_s17 = smov 96   ;;  %vm1183_vm6 = vcmask 1048320   ;;  %s1422_s25 = sshll.u32 %s1719_s21, 7 }
  0x5a   : > { %s1406_s30 = sshll.u32 %s1946_s15, 3  ;;  %1442 = vmatpush3.xpose.msk.msra.mxu0 %vm417_vm1, %v401_v2  ;;  %394 = vst.msk [vmem:[#allocation3] sm:$0xff] %vm389_vm2, %v1731_v0  ;;  %395 = vst.msk [vmem:[#allocation3 + $0x8] sm:$0xff] %vm389_vm2, %v1731_v0  ;;  %s384_s28 = scalar_lea.vmem %s2118_s4, %s1946_s15  ;;  %1447 = vmatpush3.msra.mxu1 %v1984_v18 }
  0x5b   : > { %s371_s13 = scalar_lea.vmem %s2114_s0, %s1406_s30  ;;  %s378_s27 = scalar_lea.vmem %s2117_s3, %s1406_s30  ;;  %1456 = vmatprep.subr.mxu0 %v1731_v0  ;;  %396 = vst.msk [vmem:[#allocation3 + $0x10] sm:$0xff] %vm389_vm2, %v1731_v0  ;;  %397 = vst.msk [vmem:[#allocation3 + $0x18] sm:$0xff] %vm389_vm2, %v1731_v0  ;;  %v1408_v7 = vld [vmem:[%s384_s28] ss:$0 sm:$0xff]  ;;  %1451 = vmatprep.subr.mxu1 %v1731_v0 }
  0x5c   : > { %v399_v3 = vld [vmem:[%s371_s13] sm:$0xff]  ;;  %s1736_s15 = smov 64   ;;  %s1737_s30 = smov 32  }
  0x5d   : > { %v403_v4 = vld [vmem:[%s378_s27] sm:$0xff]  ;;  %v400_v5 = vmul.f32 0.17677669, %v399_v3  ;;  %s364_s29 = scalar_lea.vmem [#allocation10], %s1926_s12  ;;  %s2065_s10 = scalar_lea.hbm %s2119_s5, %s1422_s25 }
  0x5e   : > { %407 = vperm.xlu0 %1555, %v403_v4   ;;  %s1245_s14 = sshll.u32 %s364_s29, 4  ;;  %s1231_s27 = scalar_lea.sflag [#allocation7], %s1923_s16  ;;  %s2067_s14 = int_to_ptr.vmem [resolvable:$true] %s1245_s14 }
  0x5f   : > { %1444 = vmatmul.mubr.msk.f32.vlgmr.msra.gmra.mrb[0].mxu0 %vm417_vm1, %v400_v5  ;;  %v494_v14 = vld [vmem:[#allocation2] sm:$0xff]  ;;  %v681_v44 = vld [vmem:[#allocation2 + $0x8] sm:$0xff]  ;;  %s1641_s24 = scalar_lea.vmem %s2067_s14, 128  ;;  %p2132_p7 = scmp.ne.s32.totalorder %s2124_s6, 0 }
  0x60   : > { %1458 = vmatprep.mubr.msk.f32.mxu0 %vm1732_vm0, %v1731_v0  ;;  %v876_v47 = vld [vmem:[#allocation2 + $0x10] sm:$0xff]  ;;  %v2014_v50 = vld [vmem:[#allocation2 + $0x18] sm:$0xff]  ;;  %p1642_p5 = scmp.ne.s32.totalorder %s2067_s14, %s1641_s24  ;;  %s1738_s21 = smov [#allocation10]  }
  0x61   : > { %s1645_s12 = sshll.u32 %s1738_s21, 4  ;;  %s1646_s12 = int_to_ptr.vmem [resolvable:$false] %s1645_s12 }
  0x62   : > { %p1643_p4 = pnand %p1642_p5, %p2132_p7  ;;  %s1647_s11 = scalar_lea.vmem %s1646_s12, 256 }
  0x63   : > { %p1648_p12 = scmp.lt.s32.totalorder %s2067_s14, %s1646_s12  ;;  %p1649_p1 = scmp.lt.s32.totalorder %s1647_s11, %s1641_s24 }
  0x64   : > { %p1644_p10 = pneg %p1643_p4 }
  0x65   : > { %p1650_p2 = por %p1649_p1, %p1648_p12 }
  0x67   : > { %p1651_p9 = pnand %p1650_p2, %p1644_p10 }
  0xdd   : > { %v408_v8 = vpop.permute.xlu0 %407 }
  0xde   : > { %v416_v9 = vadd.f32 %v1408_v7, %v408_v8 }
 0x132   : > { %v490_v10 = vpop.f32.mrb[0].mxu0 }
 0x133   : > { %v491_v11 = vadd.f32 %v490_v10, %v416_v9  ;;  %v1445_v12 = vpop.f32.mrb[1].mxu0 }
 0x135   : > { %v496_v13 = vsel %vm495_vm3, %v491_v11, -inf }
 0x136   : > { %497 = vmax.xlane.f32.xlu0 %v496_v13 }
 0x1c3   : > { %v498_v15 = vpop.xlane.xlu0 %497 }
 0x1c4   : > { %v499_v16 = vmax.f32 %v494_v14, %v498_v15 }
 0x1c6   : > { %v500_v17 = vsub.f32 %v494_v14, %v499_v16  ;;  %519 = vst.msk [vmem:[#allocation2] sm:$0xff] %vm389_vm2, %v499_v16  ;;  %505 = vperm.xlu1 %1556, %v499_v16  }
 0x1c8   : > { %v501_v43 = vmul.f32 1.442695, %v500_v17 }
 0x1ca   : > { %604 = vrot.lane.b32.xlu1 %v401_v2, %s1735_s17 }
 0x1ce   : > { %602 = vrot.lane.b32.xlu1 %v400_v5, %s1735_s17 }
 0x1d2   : > { %799 = vrot.lane.b32.xlu1 %v401_v2, %s1736_s15 }
 0x1d6   : > { %797 = vrot.lane.b32.xlu1 %v400_v5, %s1736_s15 }
 0x1da   : > { %993 = vrot.lane.b32.xlu1 %v401_v2, %s1737_s30 }
 0x1de   : > { %991 = vrot.lane.b32.xlu1 %v400_v5, %s1737_s30 }
 0x245   : > { %v506_v19 = vpop.permute.xlu1 %505 }
 0x246   : > { %v508_v20 = vsub.f32 %v491_v11, %v506_v19 }
 0x248   : > { %v509_v21 = vmul.f32 1.442695, %v508_v20  ;;  %v511_v20 = vld [vmem:[#allocation3] sm:$0xff] }
 0x249   : > { %v605_v22 = vpop.permute.xlu1 %604 }
 0x24a   : > { %1557 = vpow2.f32 %v509_v21 }
 0x24b   : > { %1559 = vpow2.f32 %v501_v43 }
 0x24d   : > { %v603_v23 = vpop.permute.xlu1 %602 }
 0x251   : > { %v800_v24 = vpop.permute.xlu1 %799 }
 0x254   : > { %v1558_v25 = vpop.eup %1557 }
 0x255   : > { %1449 = vmatmul.mubr.msk.f32.vlgmr.msra.gmra.mrb[0].mxu1 %vm495_vm3, %v1558_v25  ;;  %v798_v26 = vpop.permute.xlu1 %797  ;;  %v1560_v53 = vpop.eup %1559  ;;  %v513_v55 = vsel %vm495_vm3, %v1558_v25, 0.0  ;;  %v698_v25 = vld [vmem:[#allocation3 + $0x8] sm:$0xff] }
 0x256   : > { %1452 = vmatpush3.xpose.msk.msra.mxu1 %vm417_vm1, %v605_v22  ;;  %1453 = vmatprep.mubr.msk.f32.mxu1 %vm1732_vm0, %v1731_v0  ;;  %v512_v21 = vmul.f32 %v1560_v53, %v511_v20 }
 0x257   : > { %1461 = vmatprep.subr.mxu1 %v1731_v0 }
 0x259   : > { %1454 = vmatmul.mubr.msk.f32.vlgmr.msra.gmra.mrb[2].mxu1 %vm417_vm1, %v603_v23  ;;  %v994_v27 = vpop.permute.xlu1 %993 }
 0x25a   : > { %1462 = vmatpush3.xpose.msk.msra.mxu1 %vm417_vm1, %v800_v24  ;;  %1463 = vmatprep.mubr.msk.f32.mxu1 %vm1732_vm0, %v1731_v0 }
 0x25b   : > { %1471 = vmatprep.subr.mxu1 %v1731_v0 }
 0x25d   : > { %1464 = vmatmul.mubr.msk.f32.vlgmr.msra.gmra.mrb[4].mxu1 %vm417_vm1, %v798_v26  ;;  %v992_v28 = vpop.permute.xlu1 %991 }
 0x25e   : > { %1472 = vmatpush3.xpose.msk.msra.mxu1 %vm417_vm1, %v994_v27  ;;  %1473 = vmatprep.mubr.msk.f32.mxu1 %vm1732_vm0, %v1731_v0 }
 0x261   : > { %1474 = vmatmul.mubr.msk.f32.vlgmr.msra.gmra.mrb[6].mxu1 %vm417_vm1, %v992_v28  ;;  %v893_v28 = vld [vmem:[#allocation3 + $0x10] sm:$0xff] }
 0x328   : > { %v2008_v29 = vpop.f32.mrb[0].mxu1 }
 0x329   : > { %v1450_v30 = vpop.f32.mrb[1].mxu1 }
 0x32c   : > { %v676_v31 = vpop.f32.mrb[2].mxu1 }
 0x32d   : > { %v677_v32 = vadd.f32 %v676_v31, %v416_v9  ;;  %v1455_v33 = vpop.f32.mrb[3].mxu1 }
 0x32f   : > { %v682_v34 = vsel %vm495_vm3, %v677_v32, -inf }
 0x330   : > { %683 = vmax.xlane.f32.xlu1 %v682_v34  ;;  %v871_v35 = vpop.f32.mrb[4].mxu1 }
 0x331   : > { %v872_v36 = vadd.f32 %v871_v35, %v416_v9  ;;  %v1465_v37 = vpop.f32.mrb[5].mxu1 }
 0x333   : > { %v877_v38 = vsel %vm495_vm3, %v872_v36, -inf }
 0x334   : > { %878 = vmax.xlane.f32.xlu0 %v877_v38  ;;  %v1065_v39 = vpop.f32.mrb[6].mxu1 }
 0x335   : > { %v1066_v40 = vadd.f32 %v1065_v39, %v416_v9  ;;  %v1475_v41 = vpop.f32.mrb[7].mxu1 }
 0x337   : > { %v1071_v42 = vsel %vm495_vm3, %v1066_v40, -inf }
 0x338   : > { %1072 = vmax.xlane.f32.xlu0 %v1071_v42 }
 0x3bd   : > { %v684_v45 = vpop.xlane.xlu1 %683 }
 0x3be   : > { %v685_v46 = vmax.f32 %v681_v44, %v684_v45 }
 0x3c0   : > { %705 = vst.msk [vmem:[#allocation2 + $0x8] sm:$0xff] %vm389_vm2, %v685_v46  ;;  %691 = vperm.xlu0 %1555, %v685_v46   ;;  %v686_v56 = vsub.f32 %v681_v44, %v685_v46 }
 0x3c1   : > { %v879_v48 = vpop.xlane.xlu0 %878 }
 0x3c2   : > { %v880_v49 = vmax.f32 %v876_v47, %v879_v48  ;;  %v687_v57 = vmul.f32 1.442695, %v686_v56 }
 0x3c4   : > { %900 = vst.msk [vmem:[#allocation2 + $0x10] sm:$0xff] %vm389_vm2, %v880_v49  ;;  %886 = vperm.xlu1 %1556, %v880_v49   ;;  %714 = vrot.lane.b32.xlu0 %v1984_v18, %s1735_s17  ;;  %v881_v58 = vsub.f32 %v876_v47, %v880_v49  ;;  %1561 = vpow2.f32 %v687_v57 }
 0x3c5   : > { %v1073_v51 = vpop.xlane.xlu0 %1072 }
 0x3c6   : > { %v2020_v52 = vmax.f32 %v2014_v50, %v1073_v51  ;;  %v882_v59 = vmul.f32 1.442695, %v881_v58 }
 0x3c8   : > { %v1075_v54 = vsub.f32 %v2014_v50, %v2020_v52  ;;  %1094 = vst.msk [vmem:[#allocation2 + $0x18] sm:$0xff] %vm389_vm2, %v2020_v52  ;;  %1080 = vperm.xlu0 %1555, %v2020_v52   ;;  %523 = vperm.xlu1 %1556, %v1560_v53   ;;  %1563 = vpow2.f32 %v882_v59 }
 0x3ca   : > { %v1076_v24 = vmul.f32 1.442695, %v1075_v54 }
 0x3cc   : > { %908 = vrot.lane.b32.xlu0 %v1984_v18, %s1736_s15 }
 0x3ce   : > { %v1562_v60 = vpop.eup %1561 }
 0x3cf   : > { %v699_v26 = vmul.f32 %v1562_v60, %v698_v25 }
 0x3d0   : > { %1102 = vrot.lane.b32.xlu0 %v1984_v18, %s1737_s30 }
 0x3d2   : > { %v1564_v61 = vpop.eup %1563 }
 0x3ef   : > { %514 = vadd.xlane.f32.xlu0 %v513_v55 }
 0x405   : > { %709 = vperm.xlu0 %1555, %v1562_v60  }
 0x409   : > { %904 = vperm.xlu0 %1555, %v1564_v61  }
 0x43f   : > { %v692_v62 = vpop.permute.xlu0 %691 }
 0x440   : > { %v694_v63 = vsub.f32 %v677_v32, %v692_v62  ;;  %v1087_v32 = vld [vmem:[#allocation3 + $0x18] sm:$0xff] }
 0x442   : > { %v695_v1 = vmul.f32 1.442695, %v694_v63 }
 0x443   : > { %v715_v2 = vpop.permute.xlu0 %714  ;;  %v887_v3 = vpop.permute.xlu1 %886 }
 0x444   : > { %1565 = vpow2.f32 %v695_v1  ;;  %v889_v4 = vsub.f32 %v872_v36, %v887_v3  ;;  %1457 = vmatpush3.msra.mxu0 %v715_v2 }
 0x445   : > { %1466 = vmatprep.subr.mxu0 %v1731_v0 }
 0x446   : > { %v890_v5 = vmul.f32 1.442695, %v889_v4 }
 0x447   : > { %v1081_v6 = vpop.permute.xlu0 %1080  ;;  %v524_v7 = vpop.permute.xlu1 %523 }
 0x448   : > { %1567 = vpow2.f32 %v890_v5  ;;  %v1083_v8 = vsub.f32 %v1066_v40, %v1081_v6  ;;  %v526_v9 = vmul.f32 0.0, %v524_v7 }
 0x44a   : > { %v1084_v10 = vmul.f32 1.442695, %v1083_v8  ;;  %v600_v11 = vadd.f32 %v2008_v29, %v526_v9 }
 0x44b   : > { %v909_v12 = vpop.permute.xlu0 %908 }
 0x44c   : > { %1569 = vpow2.f32 %v1084_v10  ;;  %601 = vst.msk [vmem:[#allocation4] sm:$0xff] %vm417_vm1, %v600_v11 }
 0x44d   : > { %1571 = vpow2.f32 %v1076_v24 }
 0x44e   : > { %v1566_v13 = vpop.eup %1565 }
 0x44f   : > { %1459 = vmatmul.mubr.msk.f32.vlgmr.msra.gmra.mrb[2].mxu0 %vm495_vm3, %v1566_v13  ;;  %v700_v14 = vsel %vm495_vm3, %v1566_v13, 0.0  ;;  %v1103_v15 = vpop.permute.xlu0 %1102 }
 0x450   : > { %1467 = vmatpush3.msra.mxu0 %v909_v12  ;;  %701 = vadd.xlane.f32.xlu1 %v700_v14 }
 0x451   : > { %1468 = vmatprep.mubr.msk.f32.mxu0 %vm1732_vm0, %v1731_v0  ;;  %1476 = vmatprep.subr.mxu0 %v1731_v0 }
 0x452   : > { %v1568_v16 = vpop.eup %1567 }
 0x453   : > { %1469 = vmatmul.mubr.msk.f32.vlgmr.msra.gmra.mrb[4].mxu0 %vm495_vm3, %v1568_v16  ;;  %v895_v17 = vsel %vm495_vm3, %v1568_v16, 0.0  ;;  %v706_v52 = vld [vmem:[#allocation4] sm:$0xff] }
 0x454   : > { %896 = vadd.xlane.f32.xlu1 %v895_v17  ;;  %1477 = vmatpush3.msra.mxu0 %v1103_v15 }
 0x455   : > { %1478 = vmatprep.mubr.msk.f32.mxu0 %vm1732_vm0, %v1731_v0  ;;  %v894_v0 = vmul.f32 %v1564_v61, %v893_v28 }
 0x456   : > { %v1570_v18 = vpop.eup %1569 }
 0x457   : > { %1479 = vmatmul.mubr.msk.f32.vlgmr.msra.gmra.mrb[6].mxu0 %vm495_vm3, %v1570_v18  ;;  %v1089_v19 = vsel %vm495_vm3, %v1570_v18, 0.0  ;;  %v1572_v30 = vpop.eup %1571 }
 0x458   : > { %1090 = vadd.xlane.f32.xlu1 %v1089_v19  ;;  %v1088_v34 = vmul.f32 %v1572_v30, %v1087_v32 }
 0x47c   : > { %v515_v22 = vpop.xlane.xlu0 %514 }
 0x47d   : > { %v516_v23 = vadd.f32 %v515_v22, %v512_v21 }
 0x47f   : > { %518 = vst.msk [vmem:[#allocation3] sm:$0xff] %vm389_vm2, %v516_v23 }
 0x484   : > { %v710_v51 = vpop.permute.xlu0 %709 }
 0x485   : > { %v712_v53 = vmul.f32 %v710_v51, %v706_v52 }
 0x486   : > { %v1189_v37 = vld [vmem:[#allocation3] sm:$0xff] }
 0x487   : > { %1573 = vrcp.f32 %v1189_v37 }
 0x488   : > { %v905_v56 = vpop.permute.xlu0 %904 }
 0x491   : > { %v1574_v42 = vpop.eup %1573 }
 0x4dd   : > { %v702_v27 = vpop.xlane.xlu1 %701 }
 0x4de   : > { %v703_v29 = vadd.f32 %v702_v27, %v699_v26 }
 0x4e0   : > { %704 = vst.msk [vmem:[#allocation3 + $0x8] sm:$0xff] %vm389_vm2, %v703_v29 }
 0x4e1   : > { %v897_v31 = vpop.xlane.xlu1 %896 }
 0x4e2   : > { %v898_v33 = vadd.f32 %v897_v31, %v894_v0 }
 0x4e4   : > { %899 = vst.msk [vmem:[#allocation3 + $0x10] sm:$0xff] %vm389_vm2, %v898_v33 }
 0x4e5   : > { %v1091_v35 = vpop.xlane.xlu1 %1090 }
 0x4e6   : > { %v1092_v36 = vadd.f32 %v1091_v35, %v1088_v34 }
 0x4e7   : > { %v1199_v41 = vld [vmem:[#allocation3 + $0x8] sm:$0xff] }
 0x4e8   : > { %1093 = vst.msk [vmem:[#allocation3 + $0x18] sm:$0xff] %vm389_vm2, %v1092_v36 }
 0x4eb   : > { %v1209_v38 = vld [vmem:[#allocation3 + $0x10] sm:$0xff] }
 0x4ec   : > { %1575 = vrcp.f32 %v1209_v38 }
 0x4ed   : > { %1577 = vrcp.f32 %v1199_v41 }
 0x4ef   : > { %v1219_v45 = vld [vmem:[#allocation3 + $0x18] sm:$0xff] }
 0x4f0   : > { %1579 = vrcp.f32 %v1219_v45 }
 0x4f6   : > { %v1576_v46 = vpop.eup %1575 }
 0x4f7   : > { %v1578_v49 = vpop.eup %1577 }
 0x4fa   : > { %v1580_v50 = vpop.eup %1579 }
 0x522   : > { %v786_v39 = vpop.f32.mrb[2].mxu0 }
 0x523   : > { %v1460_v40 = vpop.f32.mrb[3].mxu0  ;;  %791 = vrot.lane.b32.xlu1 %v786_v39, %s1737_s30 }
 0x526   : > { %v980_v43 = vpop.f32.mrb[4].mxu0 }
 0x527   : > { %985 = vrot.lane.b32.xlu0 %v980_v43, %s1736_s15  ;;  %v1470_v44 = vpop.f32.mrb[5].mxu0  ;;  %1193 = vperm.xlu1 %1556, %v1574_v42  }
 0x52a   : > { %v1174_v47 = vpop.f32.mrb[6].mxu0 }
 0x52b   : > { %1098 = vperm.xlu0 %1555, %v1572_v30   ;;  %v1480_v48 = vpop.f32.mrb[7].mxu0  ;;  %1213 = vperm.xlu1 %1556, %v1576_v46  }
 0x52f   : > { %1179 = vrot.lane.b32.xlu0 %v1174_v47, %s1735_s17 }
 0x533   : > { %1203 = vperm.xlu0 %1555, %v1578_v49  }
 0x537   : > { %1223 = vperm.xlu0 %1555, %v1580_v50  }
 0x595   : > { %v792_v54 = vpop.permute.xlu1 %791 }
 0x596   : > { %v794_v55 = vadd.f32 %v792_v54, %v712_v53 }
 0x598   : > { %796 = vst.msk [vmem:[#allocation4] sm:$0xff] %vm795_vm4, %v794_v55 }
 0x599   : > { %v986_v59 = vpop.permute.xlu0 %985 }
 0x59f   : > { %v901_v57 = vld [vmem:[#allocation4] sm:$0xff] }
 0x5a0   : > { %v907_v58 = vmul.f32 %v905_v56, %v901_v57 }
 0x5a2   : > { %v988_v60 = vadd.f32 %v986_v59, %v907_v58 }
 0x5a4   : > { %990 = vst.msk [vmem:[#allocation4] sm:$0xff] %vm989_vm5, %v988_v60 }
 0x5a6   : > { %v1194_v3 = vpop.permute.xlu1 %1193 }
 0x5aa   : > { %v1099_v61 = vpop.permute.xlu0 %1098  ;;  %v1214_v9 = vpop.permute.xlu1 %1213 }
 0x5ab   : > { %v1095_v62 = vld [vmem:[#allocation4] sm:$0xff] }
 0x5ac   : > { %v1101_v63 = vmul.f32 %v1099_v61, %v1095_v62 }
 0x5ae   : > { %v1180_v1 = vpop.permute.xlu0 %1179 }
 0x5af   : > { %v1182_v2 = vadd.f32 %v1180_v1, %v1101_v63 }
 0x5b1   : > { %1184 = vst.msk [vmem:[#allocation4] sm:$0xff] %vm1183_vm6, %v1182_v2 }
 0x5b2   : > { %v1204_v6 = vpop.permute.xlu0 %1203 }
 0x5b6   : > { %v1224_v12 = vpop.permute.xlu0 %1223 }
 0x5b8   : > { %v1188_v4 = vld [vmem:[#allocation4] sm:$0xff] }
 0x5b9   : > { %v1196_v5 = vmul.f32 %v1194_v3, %v1188_v4 }
 0x5bb   : > { %1197 = vst.msk [vmem:[#allocation4] sm:$0xff] %vm417_vm1, %v1196_v5 }
 0x5c2   : > { %v1198_v7 = vld [vmem:[#allocation4] sm:$0xff] }
 0x5c3   : > { %v1206_v8 = vmul.f32 %v1204_v6, %v1198_v7 }
 0x5c5   : > { %1207 = vst.msk [vmem:[#allocation4] sm:$0xff] %vm795_vm4, %v1206_v8 }
 0x5cc   : > { %v1208_v10 = vld [vmem:[#allocation4] sm:$0xff] }
 0x5cd   : > { %v1216_v11 = vmul.f32 %v1214_v9, %v1208_v10 }
 0x5cf   : > { %1217 = vst.msk [vmem:[#allocation4] sm:$0xff] %vm989_vm5, %v1216_v11 }
 0x5d6   : > { %v1218_v13 = vld [vmem:[#allocation4] sm:$0xff] }
 0x5d7   : > { %v1226_v14 = vmul.f32 %v1224_v12, %v1218_v13 }
 0x5d9   : > { %1227 = vst.msk [vmem:[#allocation4] sm:$0xff] %vm1183_vm6, %v1226_v14 }
 0x5e0   : > { %v1228_v15 = vld [vmem:[#allocation4] sm:$0xff] }
 0x5e1   : > { %1229 = vst [vmem:[%s364_s29] sm:$0xff] %v1228_v15 }
 0x5e2   : > { %1654 = shalt.err (!%p1651_p9)
}
 0x5e3   : > { %s1655_s16 = scalar_lea.hbm %s2065_s10, 128  ;;  %s1659_s15 = scalar_lea.hbm %s2119_s5, 256 }
 0x5e4   : > { %p1656_p11 = scmp.ne.s32.totalorder %s2065_s10, %s1655_s16  ;;  %p1660_p13 = scmp.lt.u32.totalorder %s2065_s10, %s2119_s5 }
 0x5e5   : > { %p1661_p8 = scmp.lt.u32.totalorder %s1659_s15, %s1655_s16  ;;  %p1663_p5 = scmp.lt.u32.totalorder %s1655_s16, %s2065_s10 }
 0x5e6   : > { %p1657_p3 = pnand %p1656_p11, %p2132_p7 }
 0x5e7   : > { %p1662_p0 = por %p1661_p8, %p1660_p13 }
 0x5e8   : > { %p1658_p6 = pneg %p1657_p3 }
 0x5e9   : > { %p1664_p4 = por %p1663_p5, %p1662_p0 }
 0x5eb   : > { %p1665_p10 = pnand %p1664_p4, %p1658_p6 }
 0x5ed   : > { %1668 = shalt.err (!%p1665_p10)
}
 0x5ee   : > { %1485 = dma.vmem_to_hbm [thread:$0]  (%p2132_p7), %s2067_s14, 128, %s2065_s10, %s1231_s27  }
 0x5ef PF: > { %s1257_s29 = sand.u32 1, %s1707_s18   ;;  %p2133_p12 = scmp.ne.s32.totalorder %s2125_s8, 0 }
 0x5f0   : > { %p2134_p1 = scmp.ge.s32.totalorder %s1727_s23, 2  ;;  %s1258_s13 = scalar_lea.sflag [#allocation7], %s1257_s29 }
 0x5f2   : > { %p1495_p2 = pnand %p2134_p1, %p2133_p12 }
 0x5f4   : > { %1702 = dma.done.wait (!%p1495_p2), %s1258_s13, 128  }
 0x5f5   : > { %1704 = vsyncadd (!%p1495_p2), %s1258_s13, 4294967168  ;;  %s24_s23 = sadd.s32 1, %s1727_s23   ;;  %s2135_s18 = smov %s1711_s19 }
 0x5f6   : > { %p21_p9 = scmp.ge.s32.totalorder %s24_s23, 4   ;;  %s2136_s19 = smov %s1715_s20 }
 0x5f7   : > { %s2137_s20 = smov %s1825_s7  ;;  %s2138_s21 = smov %s1723_s22 }
 0x5f8   : > { %s2139_s22 = smov %s2141_s26  ;;  %23 = sbr.rel (!%p21_p9) target bundleno = 8 (0x8), region = 121 }
 0x5ff   :  { %1263 = vsyncpa [#allocation6], 1 }
 0x600   :  { %1265 = vsyncpa [#allocation6 + $0x1], 1 }
 0x601   :  { %1266 = vsyncpa [#allocation9], 1 }
 0x602   :  { %1268 = vsyncpa [#allocation9 + $0x1], 1 }
 0x603   :  { %1269 = vsyncpa [#allocation7], 1 }
 0x604   :  { %1271 = vsyncpa [#allocation7 + $0x1], 1 }

</bundles_post_ra>
